<compile_context>
chip_gen: v7x
topology: tpu7x:2x2x1
jax: 0.10.0
libtpu: 0.0.40
codegen_flags: <defaults>
</compile_context>

<pallas_src>
import jax
import jax.numpy as jnp
from jax.experimental import pallas as pl
from jax.experimental.pallas import tpu as pltpu


def _round_up(x, m):
    return (x + m - 1) // m * m


def _choose_tm(b_sub):
    """Batch tile: single step for small batches; two steps for moderate
    batches so the "parallel" axis shards across both v7x TensorCores;
    512-row tiles for large batches (MXU row fill / fewer grid steps)."""
    if b_sub <= 128:
        return b_sub
    if b_sub <= 1024:
        return _round_up((b_sub + 1) // 2, 8)
    return 512


def _text_cls_linear_kernel(wid_ref, tid_ref, word_emb_ref, pos0_ref,
                            type_emb_ref, w_ref, b_ref, o_ref):
    # Per grid step:
    #   wid_ref, tid_ref : (TM, 1)  int32  CLS word / token-type ids
    #   word_emb_ref     : (V, K)   f32    word embedding table
    #   pos0_ref         : (1, K)   f32    position-0 embedding
    #   type_emb_ref     : (2, K)   f32    token-type embeddings
    #   w_ref            : (K, Np)  cd     post_text_layer_1 weight (pre-T, N-padded)
    #   b_ref            : (1, Np)  f32    bias (N-padded)
    #   o_ref            : (TM, Np) f32    relu(x @ w + b)
    tm = o_ref.shape[0]
    vocab = word_emb_ref.shape[0]

    wid = wid_ref[...]                                      # (TM, 1) int32
    tid = tid_ref[...].astype(jnp.float32)                  # (TM, 1) 0./1.

    # One-hot gather of the CLS word embedding on the MXU (fully in VMEM).
    lane_ids = jax.lax.broadcasted_iota(jnp.int32, (tm, vocab), 1)
    onehot = (lane_ids == wid).astype(word_emb_ref.dtype)   # (TM, V)
    x = jnp.dot(onehot, word_emb_ref[...],
                preferred_element_type=jnp.float32)         # (TM, K) f32

    # + position-0 embedding + token-type embedding (BERT token types are 0/1).
    x = x + pos0_ref[...]
    type0 = type_emb_ref[0:1, :]
    type1 = type_emb_ref[1:2, :]
    x = x + type0 * (1.0 - tid) + type1 * tid

    # Fused linear + bias + ReLU; operands in compute dtype, f32 acc/epilogue.
    h = jnp.dot(x.astype(w_ref.dtype), w_ref[...],
                preferred_element_type=jnp.float32)
    o_ref[...] = jnp.maximum(h + b_ref[...], 0.0)


def make_params(key, vocab, L, text_out, post_text_dim):
    """PyTorch-layout parameters (weight is (post_text_dim, text_out))."""
    ks = jax.random.split(key, 5)
    scale = 0.02
    return {
        "word_emb": scale * jax.random.normal(ks[0], (vocab, text_out), jnp.float32),
        "pos_emb": scale * jax.random.normal(ks[1], (L, text_out), jnp.float32),
        "type_emb": scale * jax.random.normal(ks[2], (2, text_out), jnp.float32),
        "post_text_layer_1_w": scale * jax.random.normal(
            ks[3], (post_text_dim, text_out), jnp.float32),
        "post_text_layer_1_b": scale * jax.random.normal(
            ks[4], (post_text_dim,), jnp.float32),
    }


def prepare_text_params(params, compute_dtype=jnp.bfloat16, lane=128):
    """One-time prep (outside the hot path): transpose + N-pad + cast the
    linear weight so the per-call forward never transposes, pads or casts it.
    K (text_out) is NOT padded. Bias stays f32 (epilogue)."""
    W1 = params["post_text_layer_1_w"]            # (post_text_dim, text_out)
    b1 = params["post_text_layer_1_b"]            # (post_text_dim,)
    post_text_dim, text_out = W1.shape
    n_pad = _round_up(post_text_dim, lane)

    w_t_pad = (jnp.zeros((text_out, n_pad), jnp.float32)
               .at[:, :post_text_dim].set(W1.T))
    b_pad = (jnp.zeros((1, n_pad), jnp.float32)
             .at[:, :post_text_dim].set(b1[None, :]))

    prepped = dict(params)
    prepped["w_t_pad"] = w_t_pad.astype(compute_dtype)   # bf16 MXU path on v5e/v6e/v7x
    prepped["b_pad"] = b_pad                              # f32 epilogue
    prepped["pos0"] = params["pos_emb"][0:1, :].astype(jnp.float32)
    return prepped


def text_model_base_forward(text, params):
    """text: int32 [B, 3, L]. Returns text_h [B, post_text_dim] (matches the
    PyTorch forward, which returns only text_h)."""
    B = text.shape[0]
    input_ids = text[:, 0, :]
    attn_mask = text[:, 1, :]
    type_ids = text[:, 2, :]

    # Computed by the PyTorch forward but never used downstream of it.
    _mask_len = jnp.sum(attn_mask, axis=1, keepdims=True)  # noqa: F841

    word_emb = params["word_emb"]                 # (V, K)  f32
    pos0 = params["pos0"]                         # (1, K)  f32
    type_emb = params["type_emb"]                 # (2, K)  f32
    w_pad = params["w_t_pad"]                     # (K, Np) compute dtype
    b_pad = params["b_pad"]                       # (1, Np) f32
    vocab, K = word_emb.shape
    n_pad = w_pad.shape[1]
    post_text_dim = params["post_text_layer_1_b"].shape[0]

    b_sub = _round_up(B, 8)
    tm = _choose_tm(b_sub)
    b_tot = _round_up(b_sub, tm)

    # Only the two tiny CLS id vectors are padded host-side; the gather,
    # padded activation and cast all happen inside the kernel (VMEM only).
    wid_pad = jnp.zeros((b_tot, 1), jnp.int32).at[:B, 0].set(input_ids[:, 0])
    tid_pad = jnp.zeros((b_tot, 1), jnp.int32).at[:B, 0].set(type_ids[:, 0])

    cost = pl.CostEstimate(
        flops=2 * b_tot * vocab * K + 2 * b_tot * K * n_pad + 4 * b_tot * K,
        transcendentals=0,
        bytes_accessed=(2 * b_tot * 4
                        + word_emb.size * 4 + pos0.size * 4 + type_emb.size * 4
                        + w_pad.size * w_pad.dtype.itemsize
                        + b_pad.size * 4
                        + b_tot * n_pad * 4),
    )

    out_pad = pl.pallas_call(
        _text_cls_linear_kernel,
        out_shape=jax.ShapeDtypeStruct((b_tot, n_pad), jnp.float32),
        grid_spec=pl.GridSpec(
            grid=(b_tot // tm,),
            in_specs=[
                pl.BlockSpec((tm, 1), lambda i: (i, 0)),       # CLS word ids
                pl.BlockSpec((tm, 1), lambda i: (i, 0)),       # CLS type ids
                pl.BlockSpec((vocab, K), lambda i: (0, 0)),    # word emb (grid-invariant)
                pl.BlockSpec((1, K), lambda i: (0, 0)),        # pos-0 emb
                pl.BlockSpec((2, K), lambda i: (0, 0)),        # type emb
                pl.BlockSpec((K, n_pad), lambda i: (0, 0)),    # weight (pre-T, N-padded)
                pl.BlockSpec((1, n_pad), lambda i: (0, 0)),    # bias
            ],
            out_specs=pl.BlockSpec((tm, n_pad), lambda i: (i, 0)),
        ),
        compiler_params=pltpu.CompilerParams(
            dimension_semantics=("parallel",)),   # shards batch tiles over v7x TCs
        cost_estimate=cost,
    )(wid_pad, tid_pad, word_emb, pos0, type_emb, w_pad, b_pad)

    # Slice off the alignment padding.
    return out_pad[:B, :post_text_dim]


if __name__ == "__main__":
    key = jax.random.PRNGKey(0)
    B, L = 2, 8
    vocab = 100
    text_out = 32        # args.text_out
    post_text_dim = 32   # args.post_text_dim

    k_ids, k_params = jax.random.split(key, 2)
    input_ids = jax.random.randint(k_ids, (B, L), 0, vocab, dtype=jnp.int32)
    lengths = jnp.array([L, L - 3], dtype=jnp.int32)
    attn_mask = (jnp.arange(L)[None, :] < lengths[:, None]).astype(jnp.int32)
    type_ids = jnp.zeros((B, L), dtype=jnp.int32)
    text = jnp.stack([input_ids, attn_mask, type_ids], axis=1)   # [B, 3, L]

    raw_params = make_params(k_params, vocab, L, text_out, post_text_dim)

    # plain-JAX reference for the kernel-covered path (CLS embed + linear + relu)
    cls_ref = (raw_params["word_emb"][input_ids[:, 0]]
               + raw_params["pos_emb"][0]
               + raw_params["type_emb"][type_ids[:, 0]])
    ref_h = jnp.maximum(
        cls_ref @ raw_params["post_text_layer_1_w"].T
        + raw_params["post_text_layer_1_b"], 0.0)

    # f32 path (tight tolerance)
    params_f32 = prepare_text_params(raw_params, compute_dtype=jnp.float32)
    text_h = text_model_base_forward(text, params_f32)
    jax.block_until_ready(text_h)
    assert text_h.shape == (B, post_text_dim), text_h.shape
    assert jnp.allclose(text_h, ref_h, atol=1e-5), \
        float(jnp.max(jnp.abs(text_h - ref_h)))

    # bf16 MXU fast path (v5e / v6e / v7x), validated with loose tolerance
    params_bf16 = prepare_text_params(raw_params, compute_dtype=jnp.bfloat16)
    text_h_bf16 = text_model_base_forward(text, params_bf16)
    jax.block_until_ready(text_h_bf16)
    assert text_h_bf16.shape == (B, post_text_dim), text_h_bf16.shape
    assert jnp.allclose(text_h_bf16, ref_h, atol=2e-2, rtol=2e-2), \
        float(jnp.max(jnp.abs(text_h_bf16 - ref_h)))

    print("KERNEL_OK")
</pallas_src>

<mosaic_0001>
module attributes {stable_mosaic.version = 11 : i64} {
  func.func @_text_cls_linear_kernel(%arg0: i32, %arg1: memref<8x1xi32, #tpu.memory_space<vmem>>, %arg2: memref<8x1xi32, #tpu.memory_space<vmem>>, %arg3: memref<100x32xf32, #tpu.memory_space<vmem>>, %arg4: memref<1x32xf32, #tpu.memory_space<vmem>>, %arg5: memref<2x32xf32, #tpu.memory_space<vmem>>, %arg6: memref<32x128xf32, #tpu.memory_space<vmem>>, %arg7: memref<1x128xf32, #tpu.memory_space<vmem>>, %arg8: memref<8x128xf32, #tpu.memory_space<vmem>>) attributes {dimension_semantics = [#tpu.dimension_semantics<parallel>], iteration_bounds = array<i64: 1>, scalar_prefetch = 0 : i64, scratch_operands = 0 : i64, tpu.core_type = #tpu.core_type<tc>, window_params = [{transform_indices = @transform_0, window_bounds = array<i64: 8, 1>}, {transform_indices = @transform_1, window_bounds = array<i64: 8, 1>}, {pipeline_mode = #tpu.pipeline_mode<synchronous>, transform_indices = @transform_2, window_bounds = array<i64: 100, 32>}, {pipeline_mode = #tpu.pipeline_mode<synchronous>, transform_indices = @transform_3, window_bounds = array<i64: 1, 32>}, {pipeline_mode = #tpu.pipeline_mode<synchronous>, transform_indices = @transform_4, window_bounds = array<i64: 2, 32>}, {pipeline_mode = #tpu.pipeline_mode<synchronous>, transform_indices = @transform_5, window_bounds = array<i64: 32, 128>}, {pipeline_mode = #tpu.pipeline_mode<synchronous>, transform_indices = @transform_6, window_bounds = array<i64: 1, 128>}, {transform_indices = @transform_7, window_bounds = array<i64: 8, 128>}]} {
    %c0 = arith.constant 0 : index
    %c0_0 = arith.constant 0 : index
    %0 = vector.load %arg1[%c0, %c0_0] : memref<8x1xi32, #tpu.memory_space<vmem>>, vector<8x1xi32>
    %c0_1 = arith.constant 0 : index
    %c0_2 = arith.constant 0 : index
    %1 = vector.load %arg2[%c0_1, %c0_2] : memref<8x1xi32, #tpu.memory_space<vmem>>, vector<8x1xi32>
    %2 = arith.sitofp %1 : vector<8x1xi32> to vector<8x1xf32>
    %3 = tpu.iota {dimensions = array<i32: 1>} : vector<8x100xi32>
    %4 = vector.broadcast %0 : vector<8x1xi32> to vector<8x100xi32>
    %5 = arith.cmpi eq, %3, %4 : vector<8x100xi32>
    %6 = arith.extui %5 : vector<8x100xi1> to vector<8x100xi32>
    %7 = arith.sitofp %6 : vector<8x100xi32> to vector<8x100xf32>
    %c0_3 = arith.constant 0 : index
    %c0_4 = arith.constant 0 : index
    %8 = vector.load %arg3[%c0_3, %c0_4] : memref<100x32xf32, #tpu.memory_space<vmem>>, vector<100x32xf32>
    %cst = arith.constant dense<0.000000e+00> : vector<8x32xf32>
    %9 = tpu.matmul %7, %8, %cst {dimension_numbers = #tpu.dot_dimension_numbers<[1], [0], [0], [1], [0, 0, 1, 1], [], []>} : vector<8x100xf32>, vector<100x32xf32>, vector<8x32xf32> -> vector<8x32xf32>
    %c0_5 = arith.constant 0 : index
    %c0_6 = arith.constant 0 : index
    %10 = vector.load %arg4[%c0_5, %c0_6] : memref<1x32xf32, #tpu.memory_space<vmem>>, vector<1x32xf32>
    %11 = vector.broadcast %10 : vector<1x32xf32> to vector<8x32xf32>
    %12 = arith.addf %9, %11 : vector<8x32xf32>
    %c0_7 = arith.constant 0 : index
    %c0_8 = arith.constant 0 : index
    %13 = vector.load %arg5[%c0_7, %c0_8] : memref<2x32xf32, #tpu.memory_space<vmem>>, vector<1x32xf32>
    %c1 = arith.constant 1 : index
    %c0_9 = arith.constant 0 : index
    %14 = vector.load %arg5[%c1, %c0_9] : memref<2x32xf32, #tpu.memory_space<vmem>>, vector<1x32xf32>
    %cst_10 = arith.constant 1.000000e+00 : f32
    %15 = vector.broadcast %cst_10 : f32 to vector<8x1xf32>
    %16 = arith.subf %15, %2 : vector<8x1xf32>
    %17 = vector.broadcast %13 : vector<1x32xf32> to vector<8x32xf32>
    %18 = vector.broadcast %16 : vector<8x1xf32> to vector<8x32xf32>
    %19 = arith.mulf %17, %18 : vector<8x32xf32>
    %20 = arith.addf %12, %19 : vector<8x32xf32>
    %21 = vector.broadcast %14 : vector<1x32xf32> to vector<8x32xf32>
    %22 = vector.broadcast %2 : vector<8x1xf32> to vector<8x32xf32>
    %23 = arith.mulf %21, %22 : vector<8x32xf32>
    %24 = arith.addf %20, %23 : vector<8x32xf32>
    %c0_11 = arith.constant 0 : index
    %c0_12 = arith.constant 0 : index
    %25 = vector.load %arg6[%c0_11, %c0_12] : memref<32x128xf32, #tpu.memory_space<vmem>>, vector<32x128xf32>
    %cst_13 = arith.constant dense<0.000000e+00> : vector<8x128xf32>
    %26 = tpu.matmul %24, %25, %cst_13 {dimension_numbers = #tpu.dot_dimension_numbers<[1], [0], [0], [1], [0, 0, 1, 1], [], []>} : vector<8x32xf32>, vector<32x128xf32>, vector<8x128xf32> -> vector<8x128xf32>
    %c0_14 = arith.constant 0 : index
    %c0_15 = arith.constant 0 : index
    %27 = vector.load %arg7[%c0_14, %c0_15] : memref<1x128xf32, #tpu.memory_space<vmem>>, vector<1x128xf32>
    %28 = vector.broadcast %27 : vector<1x128xf32> to vector<8x128xf32>
    %29 = arith.addf %26, %28 : vector<8x128xf32>
    %cst_16 = arith.constant 0.000000e+00 : f32
    %30 = vector.broadcast %cst_16 : f32 to vector<8x128xf32>
    %31 = arith.maximumf %29, %30 : vector<8x128xf32>
    %c0_17 = arith.constant 0 : index
    %c0_18 = arith.constant 0 : index
    %32 = vector.load %arg8[%c0_17, %c0_18] : memref<8x128xf32, #tpu.memory_space<vmem>>, vector<8x128xf32>
    tpu.vector_store %arg8[%c0_17, %c0_18], %31 {strides = array<i32>} : memref<8x128xf32, #tpu.memory_space<vmem>>, vector<8x128xf32>,
    return
  }
  func.func @transform_0(%arg0: i32) -> (i32, i32) {
    %c0_i32 = arith.constant 0 : i32
    %c0_i32_0 = arith.constant 0 : i32
    return %arg0, %c0_i32 : i32, i32
  }
  func.func @transform_1(%arg0: i32) -> (i32, i32) {
    %c0_i32 = arith.constant 0 : i32
    %c0_i32_0 = arith.constant 0 : i32
    return %arg0, %c0_i32 : i32, i32
  }
  func.func @transform_2(%arg0: i32) -> (i32, i32) {
    %c0_i32 = arith.constant 0 : i32
    %c0_i32_0 = arith.constant 0 : i32
    %c0_i32_1 = arith.constant 0 : i32
    return %c0_i32, %c0_i32_0 : i32, i32
  }
  func.func @transform_3(%arg0: i32) -> (i32, i32) {
    %c0_i32 = arith.constant 0 : i32
    %c0_i32_0 = arith.constant 0 : i32
    %c0_i32_1 = arith.constant 0 : i32
    return %c0_i32, %c0_i32_0 : i32, i32
  }
  func.func @transform_4(%arg0: i32) -> (i32, i32) {
    %c0_i32 = arith.constant 0 : i32
    %c0_i32_0 = arith.constant 0 : i32
    %c0_i32_1 = arith.constant 0 : i32
    return %c0_i32, %c0_i32_0 : i32, i32
  }
  func.func @transform_5(%arg0: i32) -> (i32, i32) {
    %c0_i32 = arith.constant 0 : i32
    %c0_i32_0 = arith.constant 0 : i32
    %c0_i32_1 = arith.constant 0 : i32
    return %c0_i32, %c0_i32_0 : i32, i32
  }
  func.func @transform_6(%arg0: i32) -> (i32, i32) {
    %c0_i32 = arith.constant 0 : i32
    %c0_i32_0 = arith.constant 0 : i32
    %c0_i32_1 = arith.constant 0 : i32
    return %c0_i32, %c0_i32_0 : i32, i32
  }
  func.func @transform_7(%arg0: i32) -> (i32, i32) {
    %c0_i32 = arith.constant 0 : i32
    %c0_i32_0 = arith.constant 0 : i32
    return %arg0, %c0_i32 : i32, i32
  }
}

</mosaic_0001>

<bundles_post_ra>
// kernel: tpu_custom_call.1
= control target key start
LH: loop header
LB: loop body
LE: loop exit
PB: predicated region body
PF: predicated region fallthrough
CT: control target
= control target key end

     0   :  { %v384_v3 = vmov 0   ;;  %v385_v5 = vmov 0.0|0.0   ;;  %vm386_vm0 = vmmov 0   ;;  %v387_v12 = vmov 0.0   ;;  %s510_s0 = inlined_call_operand.vmem [shape: s32[8,1], index: 0, kind: input, shape index: {}]   ;;  %s511_s1 = inlined_call_operand.vmem [shape: s32[8,1], index: 1, kind: input, shape index: {}]   ;;  %s512_s2 = inlined_call_operand.vmem [shape: f32[100,32], index: 2, kind: input, shape index: {}]   ;;  %s513_s3 = inlined_call_operand.vmem [shape: f32[1,32], index: 3, kind: input, shape index: {}]   ;;  %s514_s4 = inlined_call_operand.vmem [shape: f32[2,32], index: 4, kind: input, shape index: {}]   ;;  %s515_s5 = inlined_call_operand.vmem [shape: f32[32,128], index: 5, kind: input, shape index: {}]   ;;  %s516_s6 = inlined_call_operand.vmem [shape: f32[1,128], index: 6, kind: input, shape index: {}]   ;;  %s517_s7 = inlined_call_operand.hbm [shape: f32[8,128], index: 7, kind: output, shape index: {}]  }
   0x1   :  { %v27_v0 = vld [vmem:[%s510_s0] sm:$0xff]  ;;  %358 = vset.pattern.permute.xlu0 %v384_v3  ;;  %329 = vmatprep.subr.bf16.mxu0 %v385_v5  ;;  %v39_v6 = vld [vmem:[%s512_s2 + $0x8] sm:$0xff]  ;;  %v40_v7 = vld [vmem:[%s512_s2 + $0x10] sm:$0xff] }
   0x2   :  { %v28_v1 = vld [vmem:[%s511_s1] sm:$0xff]  ;;  %v41_v8 = vld [vmem:[%s512_s2 + $0x18] sm:$0xff]  ;;  %33 = vperm.xlu0 %358, %v27_v0   ;;  %359 = vset.pattern.permute.xlu1 %v384_v3  ;;  %v43_v14 = vld [vmem:[%s512_s2 + $0x28] sm:$0xff] }
   0x3   :  { %v38_v2 = vld [vmem:[%s512_s2] sm:$0xff]  ;;  %v29_v4 = vcvt.s32.f32 %v28_v1  ;;  %347 = vmatprep.subr.bf16.mxu1 %v385_v5  ;;  %v333_v11 = vpack.c.bf16 %v41_v8, %v40_v7  ;;  %315 = vmatprep.mubr.msk.f32.mxu0 %vm386_vm0, %v387_v12 }
   0x4   :  { %v330_v9 = vpack.c.bf16 %v39_v6, %v38_v2  ;;  %v42_v13 = vld [vmem:[%s512_s2 + $0x20] sm:$0xff]  ;;  %326 = vmatprep.mubr.msk.f32.mxu1 %vm386_vm0, %v387_v12 }
   0x5   :  { %v138_v10 = vsub.f32 1.0, %v29_v4  ;;  %156 = vperm.xlu1 %359, %v29_v4  }
   0x6   :  { %331 = vmatpush3.bf16.msra.mxu0 %v330_v9 }
   0x7   :  { %332 = vmatprep.subr.bf16.mxu0 %v385_v5 }
   0x8   :  { %12 = vsyncpa [#allocation3], 0  ;;  %145 = vperm.xlu0 %358, %v138_v10   ;;  %v336_v15 = vpack.c.bf16 %v43_v14, %v42_v13  ;;  %v44_v16 = vld [vmem:[%s512_s2 + $0x30] sm:$0xff]  ;;  %v45_v17 = vld [vmem:[%s512_s2 + $0x38] sm:$0xff]  ;;  %vm62_vm1 = vcmask 1043456   ;;  %v30_v26 = vlaneseq  ;;  %vm58_vm2 = vcmask 818176  }
   0x9   :  { %v339_v18 = vpack.c.bf16 %v45_v17, %v44_v16  ;;  %v46_v19 = vld [vmem:[%s512_s2 + $0x40] sm:$0xff]  ;;  %v47_v20 = vld [vmem:[%s512_s2 + $0x48] sm:$0xff]  ;;  %v48_v22 = vld [vmem:[%s512_s2 + $0x50] sm:$0xff]  ;;  %vm172_vm4 = vcmask 261120  }
   0xa   :  { %334 = vmatpush3.bf16.msra.mxu0 %v333_v11  ;;  %v342_v21 = vpack.c.bf16 %v47_v20, %v46_v19  ;;  %v49_v23 = vld [vmem:[%s512_s2 + $0x58] sm:$0xff]  ;;  %v50_v25 = vld [vmem:[%s512_s2 + $0x60] sm:$0xf]  ;;  %v31_v27 = vand.u32 127, %v30_v26  ;;  %v162_v31 = vld [vmem:[%s515_s5 + $0x8] sm:$0xff] }
   0xb   :  { %335 = vmatprep.subr.bf16.mxu0 %v385_v5  ;;  %v345_v24 = vpack.c.bf16 %v49_v23, %v48_v22  ;;  %v161_v30 = vld [vmem:[%s515_s5] sm:$0xff]  ;;  %v163_v33 = vld [vmem:[%s515_s5 + $0x10] sm:$0xff]  ;;  %v164_v34 = vld [vmem:[%s515_s5 + $0x18] sm:$0xff] }
   0xc   :  { %v348_v32 = vpack.c.bf16 %v162_v31, %v161_v30  ;;  %v351_v35 = vpack.c.bf16 %v164_v34, %v163_v33  ;;  %v266_v36 = vld [vmem:[%s514_s4] ss:$0 sm:$0xff]  ;;  %v267_v39 = vld [vmem:[%s514_s4 + $0x1] ss:$0 sm:$0xff] }
   0xd   :  { %v263_v38 = vld [vmem:[%s513_s3] ss:$0 sm:$0xff]  ;;  %s388_s3 = smov [#allocation2]  }
   0xe   :  { %337 = vmatpush3.bf16.msra.mxu0 %v336_v15  ;;  %349 = vmatpush3.bf16.msra.mxu1 %v348_v32  ;;  %v268_v48 = vld [vmem:[%s516_s6] ss:$0 sm:$0xff]  ;;  %s254_s18 = sshll.u32 %s388_s3, 4  ;;  %s255_s18 = int_to_ptr.vmem [resolvable:$true] %s254_s18 }
   0xf   :  { %338 = vmatprep.subr.bf16.mxu0 %v385_v5  ;;  %350 = vmatprep.subr.bf16.mxu1 %v385_v5  ;;  %s360_s4 = scalar_lea.vmem %s255_s18, 128  ;;  %p365_p1 = scmp.lt.s32.totalorder %s255_s18, %s255_s18 }
  0x10   :  { %p361_p0 = scmp.ne.s32.totalorder %s255_s18, %s360_s4  ;;  %p366_p2 = scmp.lt.s32.totalorder %s360_s4, %s360_s4 }
  0x12   :  { %340 = vmatpush3.bf16.msra.mxu0 %v339_v18  ;;  %352 = vmatpush3.bf16.msra.mxu1 %v351_v35  ;;  %p367_p3 = por %p366_p2, %p365_p1 }
  0x13   :  { %341 = vmatprep.subr.bf16.mxu0 %v385_v5 }
  0x14   :  { %p368_p4 = pnand %p367_p3, %p361_p0 }
  0x16   :  { %343 = vmatpush3.bf16.msra.mxu0 %v342_v21 }
  0x17   :  { %344 = vmatprep.subr.bf16.mxu0 %v385_v5 }
  0x1a   :  { %346 = vmatpush3.bf16.msra.mxu0 %v345_v24 }
  0x1b   :  { %313 = vmatprep.subr.mxu0 %v387_v12 }
  0x1e   :  { %314 = vmatpush3.msk.msra.mxu0 %vm62_vm1, %v50_v25 }
  0x81   :  { %v34_v28 = vpop.permute.xlu0 %33 }
  0x82   :  { %vm35_vm3 = vcmp.eq.s32.totalorder %v31_v27, %v34_v28 }
  0x83   :  { %v262_v29 = vsel %vm35_vm3, 1.0, %v387_v12 }
  0x84   :  { %316 = vmatmul.mubr.msk.f32.vlgmr.msra.gmra.mrb[0].mxu0 %vm58_vm2, %v262_v29  ;;  %v157_v40 = vpop.permute.xlu1 %156 }
  0x85   :  { %v159_v45 = vmul.f32 %v267_v39, %v157_v40 }
  0x87   :  { %v146_v37 = vpop.permute.xlu0 %145 }
  0x88   :  { %v148_v42 = vmul.f32 %v266_v36, %v146_v37 }
 0x157   :  { %v132_v41 = vpop.f32.mrb[0].mxu0 }
 0x158   :  { %v133_v43 = vadd.f32 %v263_v38, %v132_v41  ;;  %v317_v44 = vpop.f32.mrb[1].mxu0 }
 0x15a   :  { %v149_v46 = vadd.f32 %v148_v42, %v133_v43 }
 0x15c   :  { %v160_v47 = vadd.f32 %v159_v45, %v149_v46 }
 0x15e   :  { %327 = vmatmul.mubr.msk.f32.vlgmr.msra.gmra.mrb[0].mxu1 %vm172_vm4, %v160_v47 }
 0x231   :  { %v242_v49 = vpop.f32.mrb[0].mxu1 }
 0x232   :  { %v243_v50 = vadd.f32 %v268_v48, %v242_v49  ;;  %v328_v51 = vpop.f32.mrb[1].mxu1 }
 0x234   :  { %v246_v52 = vmax.f32 %v243_v50, 0.0 }
 0x236   :  { %247 = vst [vmem:[#allocation2] sm:$0xff] %v246_v52 }
 0x237   :  { %371 = shalt.err (!%p368_p4)
}
 0x238   :  { %s372_s21 = scalar_lea.hbm %s517_s7, 128 }
 0x239   :  { %p373_p5 = scmp.ne.s32.totalorder %s517_s7, %s372_s21  ;;  %p376_p6 = scmp.lt.u32.totalorder %s372_s21, %s517_s7 }
 0x23b   :  { %p378_p7 = pnand %p376_p6, %p373_p5 }
 0x23d   :  { %381 = shalt.err (!%p378_p7)
}
 0x23e   :  { %257 = dma.vmem_to_hbm [thread:$0]  %s255_s18, 128, %s517_s7, [#allocation3]  }
 0x23f   :  { %382 = dma.done.wait [#allocation3], 128  }
 0x240   :  { %383 = vsyncadd [#allocation3], 4294967168 }
 0x241   :  { %261 = vsyncpa [#allocation3], 1 }

</bundles_post_ra>
